<compile_context>
chip_gen: v7x
topology: tpu7x:2x2x1
jax: 0.10.0
libtpu: 0.0.40
codegen_flags: <defaults>
</compile_context>

<pallas_src>
import functools

import jax
import jax.numpy as jnp
from jax.experimental import pallas as pl
from jax.experimental.pallas import tpu as pltpu

# Bias for padded atom lanes: exp(pad - max) underflows to exactly 0.0 in f32
# for any realistic real logit, so padded lanes never perturb the softmax.
_PAD_BIAS = -1e30


def _duel_kernel(x_ref, w1_ref, b1_ref, w2_ref, b2_ref, o_ref,
                 *, A: int, KP: int, log_prob: bool, matmul_dtype):
    """One batch tile, all actions, single grid step.

    x_ref : (tb, D)       input tile (f32; cast to matmul_dtype in-kernel)
    w1_ref: (D, H)        layer-1 weight (matmul_dtype)
    b1_ref: (1, H)        layer-1 bias (f32)
    w2_ref: (H, A*KP)     layer-2 weight, fused over actions, atoms padded
    b2_ref: (1, A*KP)     layer-2 bias (f32, padded lanes = _PAD_BIAS)
    o_ref : (tb, A*KP)    lane-dense output (out_dtype)
    """
    tb = x_ref.shape[0]

    # Hidden layer: h = relu(x @ W1 + b1); cast x under the DMA shadow.
    x = x_ref[...].astype(matmul_dtype)
    h = jnp.dot(x, w1_ref[...], preferred_element_type=jnp.float32)
    h = jnp.maximum(h + b1_ref[...], 0.0)                       # (tb, H) f32

    # Fused second layer over all actions: (tb, H) @ (H, A*KP).
    logits = jnp.dot(h.astype(matmul_dtype), w2_ref[...],
                     preferred_element_type=jnp.float32) + b2_ref[...]

    # Per-action softmax, staying in the 2-D lane layout (no 3-D reshape).
    # Reductions use statically 64-aligned lane slices; max / normalizer are
    # broadcast back lane-wise so the expensive full-width ops (exp, mul/sub)
    # run exactly once on (tb, A*KP).
    m_parts = [jnp.max(logits[:, a * KP:(a + 1) * KP], axis=-1, keepdims=True)
               for a in range(A)]                                # A x (tb, 1)
    m_full = jnp.concatenate(
        [jnp.broadcast_to(m, (tb, KP)) for m in m_parts], axis=-1)
    shifted = logits - m_full
    e = jnp.exp(shifted)                                         # padded -> 0
    s_parts = [jnp.sum(e[:, a * KP:(a + 1) * KP], axis=-1, keepdims=True)
               for a in range(A)]                                # A x (tb, 1)

    if log_prob:
        norm = jnp.concatenate(
            [jnp.broadcast_to(jnp.log(s), (tb, KP)) for s in s_parts], axis=-1)
        out = shifted - norm
    else:
        # Exact division on the tiny (tb, 1) sums keeps the distribution
        # normalized (no approx-reciprocal drift) at negligible cost.
        norm = jnp.concatenate(
            [jnp.broadcast_to(1.0 / s, (tb, KP)) for s in s_parts], axis=-1)
        out = e * norm

    o_ref[...] = out.astype(o_ref.dtype)


def _padded_atoms(atoms: int) -> int:
    return ((atoms + 63) // 64) * 64


def _pick_batch_tile(B: int) -> int:
    """Single step for small B; >=4 steps (spans both v7x TCs and gives
    per-core pipelining) for large B, capped at 2048 rows per tile."""
    if B < 1024 or B % 32 != 0:
        return B
    tb = min(2048, B // 4)
    while B % tb != 0:
        tb //= 2
    return tb


def prepare_params(params, *, output_size, atoms, matmul_dtype=jnp.bfloat16):
    """One-time conversion: cast weights to the MXU dtype and pad the atoms
    axis of the second layer (zero weights, -1e30 bias) to a multiple of 64."""
    A, K = output_size, atoms
    KP = _padded_atoms(K)
    w1, b1, w2, b2 = params["w1"], params["b1"], params["w2"], params["b2"]
    D, H = w1.shape
    assert w2.shape == (H, A * K) and b2.shape == (A * K,)

    w2_p = jnp.zeros((H, A, KP), w2.dtype).at[:, :, :K].set(w2.reshape(H, A, K))
    b2_p = jnp.full((A, KP), _PAD_BIAS, jnp.float32).at[:, :K].set(
        b2.astype(jnp.float32).reshape(A, K))
    return {
        "w1": w1.astype(matmul_dtype),
        "b1": b1.reshape(1, H).astype(jnp.float32),
        "w2": w2_p.reshape(H, A * KP).astype(matmul_dtype),
        "b2": b2_p.reshape(1, A * KP),
    }


def categorical_duel_forward(x, prepared, *, output_size, atoms,
                             log_prob=False, matmul_dtype=jnp.bfloat16,
                             out_dtype=jnp.float32, batch_block=None):
    """x: (B, input_size) f32, prepared = prepare_params(...)
    -> (B, output_size, atoms) probabilities (or log-probabilities)."""
    B, D = x.shape
    A, K = output_size, atoms
    KP = _padded_atoms(K)
    AKP = A * KP

    w1, b1, w2, b2 = prepared["w1"], prepared["b1"], prepared["w2"], prepared["b2"]
    H = w1.shape[1]
    assert w1.shape == (D, H)
    assert w2.shape == (H, AKP) and b2.shape == (1, AKP)

    tb = _pick_batch_tile(B) if batch_block is None else batch_block
    assert B % tb == 0 and (tb == B or tb % 8 == 0), (
        "batch tile must divide B and be a multiple of 8 (or equal B)")
    grid = (B // tb,)

    # VMEM budget: I/O double-buffers + resident weights + f32 body temps.
    est = (2 * tb * D * x.dtype.itemsize
           + 2 * tb * AKP * jnp.dtype(out_dtype).itemsize
           + 2 * (D * H + H * AKP) * jnp.dtype(matmul_dtype).itemsize
           + 2 * (H + AKP) * 4
           + 8 * tb * AKP * 4
           + 2 * tb * H * 4)
    vmem_limit = int(min(64 << 20, max(16 << 20, est)))

    kernel = functools.partial(_duel_kernel, A=A, KP=KP, log_prob=log_prob,
                               matmul_dtype=matmul_dtype)

    out_flat = pl.pallas_call(
        kernel,
        out_shape=jax.ShapeDtypeStruct((B, AKP), out_dtype),
        grid=grid,
        in_specs=[
            pl.BlockSpec((tb, D), lambda i: (i, 0)),      # x tile (f32)
            pl.BlockSpec((D, H), lambda i: (0, 0)),       # w1 (resident)
            pl.BlockSpec((1, H), lambda i: (0, 0)),       # b1
            pl.BlockSpec((H, AKP), lambda i: (0, 0)),     # w2 fused + padded
            pl.BlockSpec((1, AKP), lambda i: (0, 0)),     # b2 (padded lanes -1e30)
        ],
        out_specs=pl.BlockSpec((tb, AKP), lambda i: (i, 0)),
        compiler_params=pltpu.CompilerParams(
            dimension_semantics=("parallel",),
            vmem_limit_bytes=vmem_limit,
        ),
    )(x, w1, b1, w2, b2)

    # Cheap wrapper-side reshape + slice back to the module's (B, A, K) shape.
    return out_flat.reshape(B, A, KP)[:, :, :K]


def init_params(key, input_size, hidden_size, output_size, atoms):
    """Deterministic init matching the PyTorch Linear shapes (stored (in, out))."""
    k1, k2, k3, k4 = jax.random.split(key, 4)
    bound1 = 1.0 / jnp.sqrt(input_size)
    bound2 = 1.0 / jnp.sqrt(hidden_size)
    return {
        "w1": jax.random.uniform(k1, (input_size, hidden_size),
                                 jnp.float32, -bound1, bound1),
        "b1": jax.random.uniform(k2, (hidden_size,), jnp.float32, -bound1, bound1),
        "w2": jax.random.uniform(k3, (hidden_size, output_size * atoms),
                                 jnp.float32, -bound2, bound2),
        "b2": jax.random.uniform(k4, (output_size * atoms,),
                                 jnp.float32, -bound2, bound2),
    }


def reference_forward(x, params, *, output_size, atoms, log_prob=False,
                      matmul_dtype=jnp.bfloat16):
    """Pure-JAX reference with the same bf16 MXU-operand casting as the kernel."""
    xm = x.astype(matmul_dtype)
    w1 = params["w1"].astype(matmul_dtype)
    w2 = params["w2"].astype(matmul_dtype)
    h = jnp.dot(xm, w1, preferred_element_type=jnp.float32) + params["b1"]
    h = jnp.maximum(h, 0.0)
    q = (jnp.dot(h.astype(matmul_dtype), w2, preferred_element_type=jnp.float32)
         + params["b2"]).reshape(-1, output_size, atoms)
    if log_prob:
        return jax.nn.log_softmax(q, axis=-1)
    return jax.nn.softmax(q, axis=-1)


if __name__ == "__main__":
    input_size = 32
    hidden_size = 32
    output_size = 4
    atoms = 51

    key = jax.random.PRNGKey(0)
    kx, kp, kx2 = jax.random.split(key, 3)
    params = init_params(kp, input_size, hidden_size, output_size, atoms)
    prepared = prepare_params(params, output_size=output_size, atoms=atoms)

    # Small batch (single grid step), both softmax and log-softmax paths.
    B = 2
    x = jax.random.normal(kx, (B, input_size), jnp.float32)
    for log_prob in (False, True):
        out = categorical_duel_forward(x, prepared, output_size=output_size,
                                       atoms=atoms, log_prob=log_prob)
        out = jax.block_until_ready(out)
        ref = reference_forward(x, params, output_size=output_size,
                                atoms=atoms, log_prob=log_prob)
        assert out.shape == (B, output_size, atoms)
        assert jnp.allclose(out, ref, atol=2e-3, rtol=2e-3), (
            f"mismatch vs reference (B={B}, log_prob={log_prob})")

    # Larger batch to exercise the multi-step "parallel" grid path.
    B2 = 2048
    x2 = jax.random.normal(kx2, (B2, input_size), jnp.float32)
    out2 = categorical_duel_forward(x2, prepared, output_size=output_size,
                                    atoms=atoms, log_prob=False)
    out2 = jax.block_until_ready(out2)
    ref2 = reference_forward(x2, params, output_size=output_size,
                             atoms=atoms, log_prob=False)
    assert out2.shape == (B2, output_size, atoms)
    assert jnp.allclose(out2, ref2, atol=2e-3, rtol=2e-3), (
        "mismatch vs reference (large batch)")

    print("KERNEL_OK")
</pallas_src>

<mosaic_0001>
module attributes {stable_mosaic.version = 11 : i64} {
  func.func @_duel_kernel(%arg0: i32, %arg1: memref<2x32xf32, #tpu.memory_space<vmem>>, %arg2: memref<32x32xbf16, #tpu.memory_space<vmem>>, %arg3: memref<1x32xf32, #tpu.memory_space<vmem>>, %arg4: memref<32x256xbf16, #tpu.memory_space<vmem>>, %arg5: memref<1x256xf32, #tpu.memory_space<vmem>>, %arg6: memref<2x256xf32, #tpu.memory_space<vmem>>) attributes {dimension_semantics = [#tpu.dimension_semantics<parallel>], iteration_bounds = array<i64: 1>, scalar_prefetch = 0 : i64, scratch_operands = 0 : i64, tpu.core_type = #tpu.core_type<tc>, window_params = [{transform_indices = @transform_0, window_bounds = array<i64: 2, 32>}, {pipeline_mode = #tpu.pipeline_mode<synchronous>, transform_indices = @transform_1, window_bounds = array<i64: 32, 32>}, {pipeline_mode = #tpu.pipeline_mode<synchronous>, transform_indices = @transform_2, window_bounds = array<i64: 1, 32>}, {pipeline_mode = #tpu.pipeline_mode<synchronous>, transform_indices = @transform_3, window_bounds = array<i64: 32, 256>}, {pipeline_mode = #tpu.pipeline_mode<synchronous>, transform_indices = @transform_4, window_bounds = array<i64: 1, 256>}, {transform_indices = @transform_5, window_bounds = array<i64: 2, 256>}]} {
    %c0 = arith.constant 0 : index
    %c0_0 = arith.constant 0 : index
    %0 = vector.load %arg1[%c0, %c0_0] : memref<2x32xf32, #tpu.memory_space<vmem>>, vector<2x32xf32>
    %1 = arith.truncf %0 : vector<2x32xf32> to vector<2x32xbf16>
    %c0_1 = arith.constant 0 : index
    %c0_2 = arith.constant 0 : index
    %2 = vector.load %arg2[%c0_1, %c0_2] : memref<32x32xbf16, #tpu.memory_space<vmem>>, vector<32x32xbf16>
    %cst = arith.constant dense<0.000000e+00> : vector<2x32xf32>
    %3 = tpu.matmul %1, %2, %cst {dimension_numbers = #tpu.dot_dimension_numbers<[1], [0], [0], [1], [0, 0, 1, 1], [], []>} : vector<2x32xbf16>, vector<32x32xbf16>, vector<2x32xf32> -> vector<2x32xf32>
    %c0_3 = arith.constant 0 : index
    %c0_4 = arith.constant 0 : index
    %4 = vector.load %arg3[%c0_3, %c0_4] : memref<1x32xf32, #tpu.memory_space<vmem>>, vector<1x32xf32>
    %5 = vector.broadcast %4 : vector<1x32xf32> to vector<2x32xf32>
    %6 = arith.addf %3, %5 : vector<2x32xf32>
    %cst_5 = arith.constant 0.000000e+00 : f32
    %7 = vector.broadcast %cst_5 : f32 to vector<2x32xf32>
    %8 = arith.maximumf %6, %7 : vector<2x32xf32>
    %9 = arith.truncf %8 : vector<2x32xf32> to vector<2x32xbf16>
    %c0_6 = arith.constant 0 : index
    %c0_7 = arith.constant 0 : index
    %10 = vector.load %arg4[%c0_6, %c0_7] : memref<32x256xbf16, #tpu.memory_space<vmem>>, vector<32x256xbf16>
    %cst_8 = arith.constant dense<0.000000e+00> : vector<2x256xf32>
    %11 = tpu.matmul %9, %10, %cst_8 {dimension_numbers = #tpu.dot_dimension_numbers<[1], [0], [0], [1], [0, 0, 1, 1], [], []>} : vector<2x32xbf16>, vector<32x256xbf16>, vector<2x256xf32> -> vector<2x256xf32>
    %c0_9 = arith.constant 0 : index
    %c0_10 = arith.constant 0 : index
    %12 = vector.load %arg5[%c0_9, %c0_10] : memref<1x256xf32, #tpu.memory_space<vmem>>, vector<1x256xf32>
    %13 = vector.broadcast %12 : vector<1x256xf32> to vector<2x256xf32>
    %14 = arith.addf %11, %13 : vector<2x256xf32>
    %15 = vector.extract_strided_slice %14 {offsets = [0, 0], sizes = [2, 64], strides = [1, 1]} : vector<2x256xf32> to vector<2x64xf32>
    %cst_11 = arith.constant dense<0xFF800000> : vector<2xf32>
    %16 = vector.multi_reduction <maximumf>, %15, %cst_11 [1] : vector<2x64xf32> to vector<2xf32>
    %17 = vector.shape_cast %16 : vector<2xf32> to vector<2x1xf32>
    %18 = vector.extract_strided_slice %14 {offsets = [0, 64], sizes = [2, 64], strides = [1, 1]} : vector<2x256xf32> to vector<2x64xf32>
    %cst_12 = arith.constant dense<0xFF800000> : vector<2xf32>
    %19 = vector.multi_reduction <maximumf>, %18, %cst_12 [1] : vector<2x64xf32> to vector<2xf32>
    %20 = vector.shape_cast %19 : vector<2xf32> to vector<2x1xf32>
    %21 = vector.extract_strided_slice %14 {offsets = [0, 128], sizes = [2, 64], strides = [1, 1]} : vector<2x256xf32> to vector<2x64xf32>
    %cst_13 = arith.constant dense<0xFF800000> : vector<2xf32>
    %22 = vector.multi_reduction <maximumf>, %21, %cst_13 [1] : vector<2x64xf32> to vector<2xf32>
    %23 = vector.shape_cast %22 : vector<2xf32> to vector<2x1xf32>
    %24 = vector.extract_strided_slice %14 {offsets = [0, 192], sizes = [2, 64], strides = [1, 1]} : vector<2x256xf32> to vector<2x64xf32>
    %cst_14 = arith.constant dense<0xFF800000> : vector<2xf32>
    %25 = vector.multi_reduction <maximumf>, %24, %cst_14 [1] : vector<2x64xf32> to vector<2xf32>
    %26 = vector.shape_cast %25 : vector<2xf32> to vector<2x1xf32>
    %27 = vector.shape_cast %17 : vector<2x1xf32> to vector<2x1xf32>
    %28 = vector.broadcast %27 : vector<2x1xf32> to vector<2x64xf32>
    %29 = vector.shape_cast %20 : vector<2x1xf32> to vector<2x1xf32>
    %30 = vector.broadcast %29 : vector<2x1xf32> to vector<2x64xf32>
    %31 = vector.shape_cast %23 : vector<2x1xf32> to vector<2x1xf32>
    %32 = vector.broadcast %31 : vector<2x1xf32> to vector<2x64xf32>
    %33 = vector.shape_cast %26 : vector<2x1xf32> to vector<2x1xf32>
    %34 = vector.broadcast %33 : vector<2x1xf32> to vector<2x64xf32>
    %35 = tpu.concatenate %28, %30, %32, %34 in 1 : vector<2x64xf32>, vector<2x64xf32>, vector<2x64xf32>, vector<2x64xf32> -> vector<2x256xf32>
    %36 = arith.subf %14, %35 : vector<2x256xf32>
    %37 = math.exp %36 : vector<2x256xf32>
    %38 = vector.extract_strided_slice %37 {offsets = [0, 0], sizes = [2, 64], strides = [1, 1]} : vector<2x256xf32> to vector<2x64xf32>
    %cst_15 = arith.constant dense<0.000000e+00> : vector<2xf32>
    %39 = vector.multi_reduction <add>, %38, %cst_15 [1] : vector<2x64xf32> to vector<2xf32>
    %40 = vector.shape_cast %39 : vector<2xf32> to vector<2x1xf32>
    %41 = vector.extract_strided_slice %37 {offsets = [0, 64], sizes = [2, 64], strides = [1, 1]} : vector<2x256xf32> to vector<2x64xf32>
    %cst_16 = arith.constant dense<0.000000e+00> : vector<2xf32>
    %42 = vector.multi_reduction <add>, %41, %cst_16 [1] : vector<2x64xf32> to vector<2xf32>
    %43 = vector.shape_cast %42 : vector<2xf32> to vector<2x1xf32>
    %44 = vector.extract_strided_slice %37 {offsets = [0, 128], sizes = [2, 64], strides = [1, 1]} : vector<2x256xf32> to vector<2x64xf32>
    %cst_17 = arith.constant dense<0.000000e+00> : vector<2xf32>
    %45 = vector.multi_reduction <add>, %44, %cst_17 [1] : vector<2x64xf32> to vector<2xf32>
    %46 = vector.shape_cast %45 : vector<2xf32> to vector<2x1xf32>
    %47 = vector.extract_strided_slice %37 {offsets = [0, 192], sizes = [2, 64], strides = [1, 1]} : vector<2x256xf32> to vector<2x64xf32>
    %cst_18 = arith.constant dense<0.000000e+00> : vector<2xf32>
    %48 = vector.multi_reduction <add>, %47, %cst_18 [1] : vector<2x64xf32> to vector<2xf32>
    %49 = vector.shape_cast %48 : vector<2xf32> to vector<2x1xf32>
    %cst_19 = arith.constant 1.000000e+00 : f32
    %50 = vector.broadcast %cst_19 : f32 to vector<2x1xf32>
    %51 = arith.divf %50, %40 : vector<2x1xf32>
    %52 = vector.shape_cast %51 : vector<2x1xf32> to vector<2x1xf32>
    %53 = vector.broadcast %52 : vector<2x1xf32> to vector<2x64xf32>
    %cst_20 = arith.constant 1.000000e+00 : f32
    %54 = vector.broadcast %cst_20 : f32 to vector<2x1xf32>
    %55 = arith.divf %54, %43 : vector<2x1xf32>
    %56 = vector.shape_cast %55 : vector<2x1xf32> to vector<2x1xf32>
    %57 = vector.broadcast %56 : vector<2x1xf32> to vector<2x64xf32>
    %cst_21 = arith.constant 1.000000e+00 : f32
    %58 = vector.broadcast %cst_21 : f32 to vector<2x1xf32>
    %59 = arith.divf %58, %46 : vector<2x1xf32>
    %60 = vector.shape_cast %59 : vector<2x1xf32> to vector<2x1xf32>
    %61 = vector.broadcast %60 : vector<2x1xf32> to vector<2x64xf32>
    %cst_22 = arith.constant 1.000000e+00 : f32
    %62 = vector.broadcast %cst_22 : f32 to vector<2x1xf32>
    %63 = arith.divf %62, %49 : vector<2x1xf32>
    %64 = vector.shape_cast %63 : vector<2x1xf32> to vector<2x1xf32>
    %65 = vector.broadcast %64 : vector<2x1xf32> to vector<2x64xf32>
    %66 = tpu.concatenate %53, %57, %61, %65 in 1 : vector<2x64xf32>, vector<2x64xf32>, vector<2x64xf32>, vector<2x64xf32> -> vector<2x256xf32>
    %67 = arith.mulf %37, %66 : vector<2x256xf32>
    %c0_23 = arith.constant 0 : index
    %c0_24 = arith.constant 0 : index
    %68 = vector.load %arg6[%c0_23, %c0_24] : memref<2x256xf32, #tpu.memory_space<vmem>>, vector<2x256xf32>
    tpu.vector_store %arg6[%c0_23, %c0_24], %67 {strides = array<i32>} : memref<2x256xf32, #tpu.memory_space<vmem>>, vector<2x256xf32>,
    return
  }
  func.func @transform_0(%arg0: i32) -> (i32, i32) {
    %c0_i32 = arith.constant 0 : i32
    %c0_i32_0 = arith.constant 0 : i32
    return %arg0, %c0_i32 : i32, i32
  }
  func.func @transform_1(%arg0: i32) -> (i32, i32) {
    %c0_i32 = arith.constant 0 : i32
    %c0_i32_0 = arith.constant 0 : i32
    %c0_i32_1 = arith.constant 0 : i32
    return %c0_i32, %c0_i32_0 : i32, i32
  }
  func.func @transform_2(%arg0: i32) -> (i32, i32) {
    %c0_i32 = arith.constant 0 : i32
    %c0_i32_0 = arith.constant 0 : i32
    %c0_i32_1 = arith.constant 0 : i32
    return %c0_i32, %c0_i32_0 : i32, i32
  }
  func.func @transform_3(%arg0: i32) -> (i32, i32) {
    %c0_i32 = arith.constant 0 : i32
    %c0_i32_0 = arith.constant 0 : i32
    %c0_i32_1 = arith.constant 0 : i32
    return %c0_i32, %c0_i32_0 : i32, i32
  }
  func.func @transform_4(%arg0: i32) -> (i32, i32) {
    %c0_i32 = arith.constant 0 : i32
    %c0_i32_0 = arith.constant 0 : i32
    %c0_i32_1 = arith.constant 0 : i32
    return %c0_i32, %c0_i32_0 : i32, i32
  }
  func.func @transform_5(%arg0: i32) -> (i32, i32) {
    %c0_i32 = arith.constant 0 : i32
    %c0_i32_0 = arith.constant 0 : i32
    return %arg0, %c0_i32 : i32, i32
  }
}

</mosaic_0001>

<bundles_post_ra>
// kernel: tpu_custom_call.1
= control target key start
LH: loop header
LB: loop body
LE: loop exit
PB: predicated region body
PF: predicated region fallthrough
CT: control target
= control target key end

     0   :  { %10 = vsyncpa [#allocation3], 0  ;;  %s552_s0 = inlined_call_operand.hbm [shape: f32[2,32], index: 0, kind: input, shape index: {}]   ;;  %s553_s1 = inlined_call_operand.hbm [shape: bf16[32,32], index: 1, kind: input, shape index: {}]   ;;  %s554_s2 = inlined_call_operand.vmem [shape: f32[1,32], index: 2, kind: input, shape index: {}]   ;;  %s555_s3 = inlined_call_operand.hbm [shape: bf16[32,256], index: 3, kind: input, shape index: {}]   ;;  %s556_s4 = inlined_call_operand.vmem [shape: f32[1,256], index: 4, kind: input, shape index: {}]   ;;  %s557_s5 = inlined_call_operand.hbm [shape: f32[2,256], index: 5, kind: output, shape index: {}]  }
   0x1   :  { %11 = vsyncpa [#allocation6], 0 }
   0x2   :  { %12 = vsyncpa [#allocation4], 0  ;;  %s441_s18 = smov [#allocation5]   ;;  %s347_s22 = scalar_lea.hbm %s553_s1, 256 }
   0x3   :  { %s28_s19 = sshll.u32 %s441_s18, 4  ;;  %p348_p0 = scmp.ne.s32.totalorder %s553_s1, %s347_s22  ;;  %s29_s19 = int_to_ptr.vmem [resolvable:$true] %s28_s19 }
   0x4   :  { %p351_p1 = scmp.lt.u32.totalorder %s347_s22, %s553_s1 }
   0x6   :  { %p353_p2 = pnand %p351_p1, %p348_p0 }
   0x8   :  { %356 = shalt.err (!%p353_p2)
}
   0x9   :  { %s357_s27 = scalar_lea.vmem %s29_s19, 256  ;;  %p362_p4 = scmp.lt.s32.totalorder %s29_s19, %s29_s19 }
   0xa   :  { %p358_p3 = scmp.ne.s32.totalorder %s29_s19, %s357_s27  ;;  %p363_p5 = scmp.lt.s32.totalorder %s357_s27, %s357_s27 }
   0xc   :  { %p364_p6 = por %p363_p5, %p362_p4 }
   0xe   :  { %p365_p7 = pnand %p364_p6, %p358_p3 }
  0x10   :  { %368 = shalt.err (!%p365_p7)
}
  0x11   :  { %s442_s28 = smov 64   ;;  %s443_s29 = smov 4  }
  0x12   :  { %34 = dma.hbm_to_vmem [thread:$0]  %s553_s1, 256, %s29_s19, [#allocation6], %s442_s28, %s442_s28, %s443_s29  }
  0x13   :  { %s444_s7 = smov [#allocation2]   ;;  %s445_s9 = smov [#allocation7]  }
  0x14   :  { %s19_s8 = sshll.u32 %s444_s7, 4  ;;  %s42_s10 = sshll.u32 %s445_s9, 4  ;;  %s20_s8 = int_to_ptr.vmem [resolvable:$true] %s19_s8  ;;  %s43_s10 = int_to_ptr.vmem [resolvable:$true] %s42_s10 }
  0x15   :  { %s369_s13 = scalar_lea.hbm %s552_s0, 32 }
  0x16   :  { %p370_p8 = scmp.ne.s32.totalorder %s552_s0, %s369_s13  ;;  %p373_p9 = scmp.lt.u32.totalorder %s369_s13, %s552_s0 }
  0x18   :  { %p375_p10 = pnand %p373_p9, %p370_p8 }
  0x1a   :  { %378 = shalt.err (!%p375_p10)
}
  0x1b   :  { %s379_s1 = scalar_lea.vmem %s20_s8, 32  ;;  %p384_p12 = scmp.lt.s32.totalorder %s20_s8, %s20_s8 }
  0x1c   :  { %p380_p11 = scmp.ne.s32.totalorder %s20_s8, %s379_s1  ;;  %p385_p13 = scmp.lt.s32.totalorder %s379_s1, %s379_s1 }
  0x1e   :  { %p386_p0 = por %p385_p13, %p384_p12 }
  0x20   :  { %p387_p1 = pnand %p386_p0, %p380_p11 }
  0x22   :  { %390 = shalt.err (!%p387_p1)
}
  0x23   :  { %22 = dma.hbm_to_vmem [thread:$0]  %s552_s0, 32, %s20_s8, [#allocation3]  }
  0x24   :  { %s391_s22 = scalar_lea.hbm %s555_s3, 512 }
  0x25   :  { %p392_p2 = scmp.ne.s32.totalorder %s555_s3, %s391_s22  ;;  %p395_p3 = scmp.lt.u32.totalorder %s391_s22, %s555_s3 }
  0x27   :  { %p397_p4 = pnand %p395_p3, %p392_p2 }
  0x29   :  { %400 = shalt.err (!%p397_p4)
}
  0x2a   :  { %s401_s27 = scalar_lea.vmem %s43_s10, 512  ;;  %p406_p6 = scmp.lt.s32.totalorder %s43_s10, %s43_s10 }
  0x2b   :  { %p402_p5 = scmp.ne.s32.totalorder %s43_s10, %s401_s27  ;;  %p407_p7 = scmp.lt.s32.totalorder %s401_s27, %s401_s27 }
  0x2d   :  { %p408_p8 = por %p407_p7, %p406_p6 }
  0x2f   :  { %p409_p9 = pnand %p408_p8, %p402_p5 }
  0x31   :  { %412 = shalt.err (!%p409_p9)
}
  0x32   :  { %s446_s0 = smov 128   ;;  %s447_s29 = smov 8  }
  0x33   :  { %48 = dma.hbm_to_vmem [thread:$0]  %s555_s3, 512, %s43_s10, [#allocation6], %s446_s0, %s446_s0, %s447_s29  }
  0x34   :  { %435 = dma.done.wait [#allocation3], 32  }
  0x35   :  { %436 = vsyncadd [#allocation3], 4294967264 }
  0x36   :  { %437 = dma.done.wait [#allocation6], 768  }
  0x37   :  { %438 = vsyncadd [#allocation6], 4294966528  ;;  %v448_v0 = vmov 0.0   ;;  %vm449_vm0 = vmmov 0   ;;  %v327_v1 = vld [vmem:[#allocation5] sm:$0xff]   ;;  %v328_v2 = vld [vmem:[#allocation5 + $0x8] sm:$0xff]   ;;  %v138_v18 = vlaneseq }
  0x38   :  { %308 = vmatprep.subr.bf16.mxu0 %v448_v0  ;;  %312 = vmatprep.mubr.msk.bf16.mxu0 %vm449_vm0, %v448_v0  ;;  %v61_v3 = vld [vmem:[#allocation2] sm:$0x3]  ;;  %vm86_vm1 = vcmask 261120   ;;  %v331_v6 = vld [vmem:[#allocation7] ss:$8 sps:$4 sm:$0xff]   ;;  %v450_v9 = vmov 0  }
  0x39   :  { %309 = vmatpush3.bf16.msra.mxu0 %v327_v1  ;;  %v329_v4 = vld [vmem:[#allocation7 + $0x4] ss:$8 sps:$4 sm:$0xff]   ;;  %v62_v5 = vpack.c.bf16 %v61_v3, %v61_v3  ;;  %v332_v7 = vld [vmem:[#allocation7 + $0x14] ss:$8 sps:$4 sm:$0xff]   ;;  %v334_v8 = vld [vmem:[#allocation7 + $0x10] ss:$8 sps:$4 sm:$0xff]   ;;  %203 = vmatprep.mubr.bf16.mxu1 %v450_v9 }
  0x3a   :  { %310 = vmatprep.subr.bf16.mxu0 %v448_v0  ;;  %171 = vmatprep.subr.bf16.mxu1 %v329_v4  ;;  %v295_v10 = vld [vmem:[%s554_s2] ss:$0 sm:$0xff]  ;;  %v139_v19 = vshrl.u32 %v138_v18, 7  ;;  %vm212_vm2 = vcmask 517120   ;;  %vm216_vm3 = vcmask 1041920   ;;  %vm226_vm4 = vcmask 523264  }
  0x3b   :  { %172 = vmatpush1.bf16.msra.mxu1 %v331_v6  ;;  %v136_v21 = vld [vmem:[%s556_s4] sm:$0x3]  ;;  %s451_s2 = smov [#allocation8]  }
  0x3c   :  { %173 = vmatprep.subr.bf16.mxu1 %v332_v7  ;;  %v140_v20 = vsub.s32 0, %v139_v19  ;;  %v144_v22 = vsub.s32 1, %v139_v19  ;;  %s285_s4 = sshll.u32 %s451_s2, 4  ;;  %s286_s4 = int_to_ptr.vmem [resolvable:$true] %s285_s4 }
  0x3d   :  { %311 = vmatpush3.bf16.msra.mxu0 %v328_v2  ;;  %p418_p11 = scmp.lt.s32.totalorder %s286_s4, %s286_s4 }
  0x3e   :  { %v141_v23 = vrot.slane %v136_v21, %v140_v20  ;;  %v145_v24 = vrot.slane %v136_v21, %v144_v22 }
  0x3f   :  { %174 = vmatpush1.bf16.msra.mxu1 %v334_v8 }
  0x40   :  { %313 = vmatmul.mubr.msk.bf16.vlgmr.msra.gmra.mrb[0].mxu0 %vm86_vm1, %v62_v5 }
 0x113   :  { %v124_v11 = vpop.f32.mrb[0].mxu0 }
 0x114   :  { %v125_v12 = vadd.f32 %v295_v10, %v124_v11  ;;  %v314_v13 = vpop.f32.mrb[1].mxu0 }
 0x115   :  { %v127_v14 = vpop.f32.mrb[2].mxu0 }
 0x116   :  { %v130_v15 = vmax.f32 %v125_v12, 0.0  ;;  %v315_v16 = vpop.f32.mrb[3].mxu0 }
 0x118   :  { %v131_v17 = vpack.c.bf16 %v130_v15, %v130_v15 }
 0x11a   :  { %303 = vmatmul.mubr.msk.bf16.vlgmr.msra.gmra.mrb[0].mxu1 %vm86_vm1, %v131_v17 }
 0x1ed   :  { %v205_v25 = vpop.f32.mrb[0].mxu1 }
 0x1ee   :  { %v206_v26 = vadd.f32 %v205_v25, %v141_v23  ;;  %v207_v27 = vpop.f32.mrb[1].mxu1 }
 0x1ef   :  { %v208_v28 = vadd.f32 %v207_v27, %v145_v24  ;;  %v209_v29 = vpop.f32.mrb[2].mxu1 }
 0x1f0   :  { %v210_v30 = vpop.f32.mrb[3].mxu1  ;;  %v213_v31 = vsel %vm212_vm2, %v206_v26, -inf  ;;  %v217_v33 = vsel %vm216_vm3, %v206_v26, -inf }
 0x1f1   :  { %214 = vmax.xlane.f32.xlu0 %v213_v31  ;;  %v220_v32 = vsel %vm212_vm2, %v208_v28, -inf  ;;  %v223_v34 = vsel %vm216_vm3, %v208_v28, -inf }
 0x1f2   :  { %221 = vmax.xlane.f32.xlu1 %v220_v32 }
 0x1f5   :  { %218 = vmax.xlane.f32.xlu0 %v217_v33 }
 0x1f6   :  { %224 = vmax.xlane.f32.xlu1 %v223_v34 }
 0x27e   :  { %v215_v35 = vpop.xlane.xlu0 %214 }
 0x27f   :  { %v222_v36 = vpop.xlane.xlu1 %221 }
 0x282   :  { %v219_v37 = vpop.xlane.xlu0 %218 }
 0x283   :  { %v227_v38 = vsel %vm226_vm4, %v215_v35, %v219_v37  ;;  %v225_v39 = vpop.xlane.xlu1 %224 }
 0x284   :  { %v229_v40 = vsub.f32 %v206_v26, %v227_v38  ;;  %v228_v41 = vsel %vm226_vm4, %v222_v36, %v225_v39 }
 0x285   :  { %v230_v42 = vsub.f32 %v208_v28, %v228_v41 }
 0x286   :  { %v231_v43 = vmul.f32 1.442695, %v229_v40 }
 0x287   :  { %v233_v44 = vmul.f32 1.442695, %v230_v42 }
 0x288   :  { %335 = vpow2.f32 %v231_v43 }
 0x289   :  { %337 = vpow2.f32 %v233_v44 }
 0x292   :  { %v336_v45 = vpop.eup %335 }
 0x293   :  { %v338_v46 = vpop.eup %337  ;;  %239 = vrot.lane.b32.xlu0 %v336_v45, %s442_s28  ;;  %v235_v47 = vsel %vm212_vm2, %v336_v45, 0.0 }
 0x294   :  { %249 = vrot.lane.b32.xlu1 %v338_v46, %s442_s28  ;;  %v245_v52 = vsel %vm212_vm2, %v338_v46, 0.0  ;;  %s413_s28 = scalar_lea.vmem %s286_s4, 64 }
 0x295   :  { %p414_p10 = scmp.ne.s32.totalorder %s286_s4, %s413_s28  ;;  %p419_p12 = scmp.lt.s32.totalorder %s413_s28, %s413_s28 }
 0x297   :  { %p420_p13 = por %p419_p12, %p418_p11 }
 0x299   :  { %p421_p0 = pnand %p420_p13, %p414_p10 }
 0x2b8   :  { %236 = vadd.xlane.f32.xlu1 %v235_v47 }
 0x305   :  { %v240_v48 = vpop.permute.xlu0 %239 }
 0x306   :  { %v250_v49 = vpop.permute.xlu1 %249  ;;  %v242_v50 = vsel %vm212_vm2, %v240_v48, 0.0 }
 0x307   :  { %243 = vadd.xlane.f32.xlu0 %v242_v50  ;;  %v252_v51 = vsel %vm212_vm2, %v250_v49, 0.0 }
 0x308   :  { %253 = vadd.xlane.f32.xlu1 %v252_v51 }
 0x30b   :  { %246 = vadd.xlane.f32.xlu0 %v245_v52 }
 0x345   :  { %v237_v53 = vpop.xlane.xlu1 %236 }
 0x394   :  { %v244_v54 = vpop.xlane.xlu0 %243 }
 0x395   :  { %339 = vrcp.f32 %v244_v54  ;;  %v254_v55 = vpop.xlane.xlu1 %253 }
 0x396   :  { %341 = vrcp.f32 %v237_v53 }
 0x397   :  { %343 = vrcp.f32 %v254_v55 }
 0x398   :  { %v247_v56 = vpop.xlane.xlu0 %246 }
 0x399   :  { %345 = vrcp.f32 %v247_v56 }
 0x39f   :  { %v340_v57 = vpop.eup %339 }
 0x3a0   :  { %v342_v58 = vpop.eup %341 }
 0x3a1   :  { %v344_v59 = vpop.eup %343  ;;  %v263_v60 = vsel %vm226_vm4, %v342_v58, %v340_v57 }
 0x3a2   :  { %v265_v63 = vmul.f32 %v336_v45, %v263_v60 }
 0x3a3   :  { %v346_v61 = vpop.eup %345 }
 0x3a4   :  { %v264_v62 = vsel %vm226_vm4, %v346_v61, %v344_v59 }
 0x3a5   :  { %v266_v0 = vmul.f32 %v338_v46, %v264_v62 }
 0x3a7   :  { %v269_v1 = vcombine.low %v265_v63, %v266_v0 }
 0x3a9   :  { %304 = vst.sshfl [vmem:[#allocation8] sm:$0x33 pattern:$0x76325410] %v269_v1 }
 0x3aa   :  { %424 = shalt.err (!%p421_p0)
}
 0x3ab   :  { %s425_s12 = scalar_lea.hbm %s557_s5, 64 }
 0x3ac   :  { %p426_p1 = scmp.ne.s32.totalorder %s557_s5, %s425_s12  ;;  %p429_p2 = scmp.lt.u32.totalorder %s425_s12, %s557_s5 }
 0x3ae   :  { %p431_p3 = pnand %p429_p2, %p426_p1 }
 0x3b0   :  { %434 = shalt.err (!%p431_p3)
}
 0x3b1   :  { %288 = dma.vmem_to_hbm [thread:$0]  %s286_s4, 64, %s557_s5, [#allocation4]  }
 0x3b2   :  { %439 = dma.done.wait [#allocation4], 64  }
 0x3b3   :  { %440 = vsyncadd [#allocation4], 4294967232 }
 0x3b4   :  { %292 = vsyncpa [#allocation3], 1 }
 0x3b5   :  { %293 = vsyncpa [#allocation6], 1 }
 0x3b6   :  { %294 = vsyncpa [#allocation4], 1 }

</bundles_post_ra>
